<compile_context>
chip_gen: v7x
topology: tpu7x:2x2x1
jax: 0.10.0
libtpu: 0.0.40
codegen_flags: <defaults>
</compile_context>

<pallas_src>
import jax
import jax.numpy as jnp
from jax.experimental import pallas as pl
from jax.experimental.pallas import tpu as pltpu

_SQRT_HALF = 0.7071067811865476


def _round_up(x, m):
    return ((x + m - 1) // m) * m


def _vmem_capacity_bytes():
    try:
        return int(pltpu.get_tpu_info().vmem_capacity_bytes)
    except Exception:
        return 64 * 1024 * 1024  # conservative fallback: v7x per-TC VMEM


def _mlp_kernel(x_ref, w1_ref, b1_ref, w2_ref, b2_ref, o_ref, *maybe_acc):
    # x_ref: (tm, in_f)    w1_ref: (in_f, tk)   b1_ref: (1, tk)
    # w2_ref: (tk, tn)     b2_ref: (1, tn)      o_ref: (tm, tn)
    # maybe_acc: optional (tm, tn) f32 scratch (only for non-f32 outputs).
    k = pl.program_id(2)
    acc_ref = maybe_acc[0] if maybe_acc else o_ref  # f32 out: accumulate in place

    @pl.when(k == 0)
    def _init():
        acc_ref[...] = jnp.zeros_like(acc_ref)

    # fc1 on the MXU, f32 accumulation (inputs optionally cast to bf16).
    h = jnp.dot(x_ref[...].astype(w1_ref.dtype), w1_ref[...],
                preferred_element_type=jnp.float32)
    h = h + b1_ref[...].astype(jnp.float32)
    # Exact (erf) GELU — matches torch.nn.GELU() default numerics.
    h = 0.5 * h * (1.0 + jax.lax.erf(h * jnp.float32(_SQRT_HALF)))

    # fc2 contribution of this hidden slab to the (tm, tn) output block.
    acc_ref[...] += jnp.dot(h.astype(w2_ref.dtype), w2_ref[...],
                            preferred_element_type=jnp.float32)

    @pl.when(k == pl.num_programs(2) - 1)
    def _finalize():
        o_ref[...] = (acc_ref[...]
                      + b2_ref[...].astype(jnp.float32)).astype(o_ref.dtype)


def _pick_tiles(n, in_f, hid, out_f, x_bytes, w_bytes, o_bytes, use_scratch,
                budget):
    out_full = _round_up(out_f, 128)

    # Row tile: multiple of 8, <= padded row count; keep >=2 row blocks when
    # possible so v7x's two TensorCores both get work (no-op on v5e/v6e).
    tm_max = _round_up(n, 8)
    if n > 8:
        tm_max = min(tm_max, _round_up((n + 1) // 2, 8))
    tm_cands = [t for t in (1024, 512, 256, 128, 64, 32, 16, 8) if t <= tm_max]
    if not tm_cands:
        tm_cands = [tm_max]
    tk_cands = [hid] + [t for t in (1024, 512, 256) if t < hid]
    tn_cands = [out_full] + [t for t in (2048, 1024, 512, 256, 128)
                             if t < out_full]

    def footprint(tm, tk, tn):
        b = (2 * tm * in_f * x_bytes        # x tile (double buffered)
             + 2 * in_f * tk * w_bytes      # W1 slab
             + 2 * tk * 4                   # b1 slab
             + 2 * tk * tn * w_bytes        # W2 slab
             + 2 * tn * 4                   # b2 slab
             + 2 * tm * tn * o_bytes)       # output tile
        if use_scratch:
            b += tm * tn * 4                # f32 accumulator scratch
        return b

    def fits(tm, tk, tn):
        return footprint(tm, tk, tn) + (2 << 20) <= budget

    # 1) Preferred: whole W1/W2 VMEM-resident (single hidden & out block) so
    #    weights are streamed from HBM once for the entire grid.
    for tm in tm_cands:
        if fits(tm, hid, out_full):
            if tm >= 256 or tm == tm_cands[0]:
                return tm, hid, out_full
            break
    # 2) Otherwise keep the row tile as large as possible (arithmetic-intensity
    #    knob) and tile the out / hidden dims to fit the VMEM budget.
    for tm in tm_cands:
        for tn in tn_cands:
            for tk in tk_cands:
                if fits(tm, tk, tn):
                    return tm, tk, tn
    # 3) Last resort for extremely wide in_features.
    # TODO(synk): tile in_features as well for inputs too wide for VMEM.
    return tm_cands[-1], tk_cands[-1], tn_cands[-1]


def mlp_forward(x, w1, b1, w2, b2, *, matmul_dtype=None):
    """Forward of the PyTorch `Mlp` (Linear -> GELU -> Linear, drop=0.0).

    x: (..., in_features). w1: (in, hid), b1: (hid,), w2: (hid, out), b2: (out,).
    Weights are stored (in, out), i.e. transposed w.r.t. torch Linear.weight.
    matmul_dtype: optional narrower dtype (e.g. jnp.bfloat16) for the two MXU
    matmuls; accumulation and the GELU stay in f32.
    """
    in_f, hid = w1.shape
    hid2, out_f = w2.shape
    assert hid == hid2, "w1/w2 hidden dims must match"

    orig_shape = x.shape
    x2 = x.reshape(-1, in_f)
    n = x2.shape[0]

    w_dtype = matmul_dtype if matmul_dtype is not None else w1.dtype
    out_dtype = x.dtype
    use_scratch = out_dtype != jnp.float32  # f32 outputs accumulate in-place

    x_bytes = jnp.dtype(x.dtype).itemsize
    w_bytes = jnp.dtype(w_dtype).itemsize
    o_bytes = jnp.dtype(out_dtype).itemsize

    vmem_cap = _vmem_capacity_bytes()
    budget = int(vmem_cap * 0.75)  # headroom for Mosaic internal scratch

    tm, tk, tn = _pick_tiles(n, in_f, hid, out_f, x_bytes, w_bytes, o_bytes,
                             use_scratch, budget)

    n_pad = _round_up(n, tm)
    hid_pad = hid if tk == hid else _round_up(hid, tk)
    out_pad = _round_up(out_f, tn)

    # Zero padding is exact: GELU(0) = 0 and zero weight rows/cols contribute 0;
    # padded rows / output lanes are sliced off below.  (For repeated calls,
    # pre-pad weights once outside the hot path or jit this wrapper so XLA
    # hoists the constant-weight pads.)
    if n_pad != n:
        x2 = jnp.pad(x2, ((0, n_pad - n), (0, 0)))
    w1p = w1 if hid_pad == hid else jnp.pad(w1, ((0, 0), (0, hid_pad - hid)))
    b1p = b1 if hid_pad == hid else jnp.pad(b1, (0, hid_pad - hid))
    if hid_pad != hid or out_pad != out_f:
        w2p = jnp.pad(w2, ((0, hid_pad - hid), (0, out_pad - out_f)))
    else:
        w2p = w2
    b2p = b2 if out_pad == out_f else jnp.pad(b2, (0, out_pad - out_f))

    w1p = w1p.astype(w_dtype)
    w2p = w2p.astype(w_dtype)
    b1_2d = b1p.reshape(1, hid_pad)
    b2_2d = b2p.reshape(1, out_pad)

    ni, nj, nk = n_pad // tm, out_pad // tn, hid_pad // tk
    grid = (ni, nj, nk)

    scratch_shapes = [pltpu.VMEM((tm, tn), jnp.float32)] if use_scratch else []

    # VMEM limit from the actual tile footprint, capped below physical VMEM
    # (64 MiB/TC on v7x, 128 MiB on v5e/v6e) so Mosaic keeps its own headroom.
    footprint = (2 * tm * in_f * x_bytes + 2 * in_f * tk * w_bytes
                 + 2 * tk * 4 + 2 * tk * tn * w_bytes + 2 * tn * 4
                 + 2 * tm * tn * o_bytes + (tm * tn * 4 if use_scratch else 0))
    vmem_limit = min(int(vmem_cap * 0.9),
                     max(int(footprint * 1.25), 32 * 1024 * 1024))

    # Cost estimate with realistic HBM traffic: weights are re-streamed per row
    # tile unless the hidden/out grid extents are 1 (then fetched exactly once).
    flops = 2 * n_pad * in_f * hid_pad + 2 * n_pad * hid_pad * out_pad
    w1_bytes = (1 if nk == 1 else ni * nj) * in_f * hid_pad * w_bytes
    w2_bytes = (1 if (nk == 1 and nj == 1) else ni) * hid_pad * out_pad * w_bytes
    bytes_accessed = int(n_pad * in_f * x_bytes + w1_bytes + w2_bytes
                         + n_pad * out_pad * o_bytes + hid_pad * 4 + out_pad * 4)

    # TODO(synk): if profiling shows exposed W2 DMA at small in_f, bump the W2
    # BlockSpec to pipeline_mode=pl.Buffered(3) and budget the extra buffer.
    out = pl.pallas_call(
        _mlp_kernel,
        out_shape=jax.ShapeDtypeStruct((n_pad, out_pad), out_dtype),
        grid_spec=pltpu.PrefetchScalarGridSpec(
            num_scalar_prefetch=0,
            grid=grid,
            in_specs=[
                pl.BlockSpec((tm, in_f), lambda i, j, k: (i, 0)),   # x rows
                pl.BlockSpec((in_f, tk), lambda i, j, k: (0, k)),   # W1 slab
                pl.BlockSpec((1, tk), lambda i, j, k: (0, k)),      # b1 slab
                pl.BlockSpec((tk, tn), lambda i, j, k: (k, j)),     # W2 slab
                pl.BlockSpec((1, tn), lambda i, j, k: (0, j)),      # b2 slab
            ],
            out_specs=pl.BlockSpec((tm, tn), lambda i, j, k: (i, j)),
            scratch_shapes=scratch_shapes,
        ),
        compiler_params=pltpu.CompilerParams(
            dimension_semantics=("parallel", "parallel", "arbitrary"),
            vmem_limit_bytes=vmem_limit),
        cost_estimate=pl.CostEstimate(flops=flops,
                                      transcendentals=n_pad * hid_pad,
                                      bytes_accessed=bytes_accessed),
    )(x2, w1p, b1_2d, w2p, b2_2d)

    out = out[:n, :out_f]
    return out.reshape(orig_shape[:-1] + (out_f,))


if __name__ == "__main__":
    # Small shapes consistent with the module (token features + hidden expansion).
    batch, seq = 2, 8
    in_features, hidden_features, out_features = 32, 64, 32

    key = jax.random.PRNGKey(0)
    kx, k1, k2, k3, k4 = jax.random.split(key, 5)

    # Deterministic parameter init (uniform, like nn.Linear's default scheme).
    bound1 = 1.0 / (in_features ** 0.5)
    bound2 = 1.0 / (hidden_features ** 0.5)
    w1 = jax.random.uniform(k1, (in_features, hidden_features),
                            minval=-bound1, maxval=bound1, dtype=jnp.float32)
    b1 = jax.random.uniform(k2, (hidden_features,),
                            minval=-bound1, maxval=bound1, dtype=jnp.float32)
    w2 = jax.random.uniform(k3, (hidden_features, out_features),
                            minval=-bound2, maxval=bound2, dtype=jnp.float32)
    b2 = jax.random.uniform(k4, (out_features,),
                            minval=-bound2, maxval=bound2, dtype=jnp.float32)
    x = jax.random.normal(kx, (batch, seq, in_features), dtype=jnp.float32)

    # Reference in plain JAX (same math, exact erf-GELU).
    h_ref = x @ w1 + b1
    h_ref = 0.5 * h_ref * (1.0 + jax.lax.erf(h_ref / jnp.sqrt(2.0)))
    y_ref = h_ref @ w2 + b2

    # 1) Exact f32 path (torch-parity numerics).
    y = mlp_forward(x, w1, b1, w2, b2)
    jax.block_until_ready(y)
    assert y.shape == (batch, seq, out_features)
    assert jnp.allclose(y, y_ref, atol=1e-5, rtol=1e-5)

    # 2) bf16-MXU fast path (f32 accumulation / GELU), f32 output.
    y_bf = mlp_forward(x, w1, b1, w2, b2, matmul_dtype=jnp.bfloat16)
    jax.block_until_ready(y_bf)
    assert jnp.allclose(y_bf, y_ref, atol=1e-1, rtol=1e-1)

    # 3) bf16 activations (exercises the f32 scratch-accumulator kernel path).
    y_bf16_io = mlp_forward(x.astype(jnp.bfloat16), w1, b1, w2, b2,
                            matmul_dtype=jnp.bfloat16)
    jax.block_until_ready(y_bf16_io)
    assert y_bf16_io.shape == (batch, seq, out_features)
    assert jnp.allclose(y_bf16_io.astype(jnp.float32), y_ref, atol=1e-1, rtol=1e-1)

    # TODO(synk): drop>0.0 (nn.Dropout) would need pltpu.prng_random_bits
    # masking inside the kernel; drop=0.0 -> Identity is what is implemented.
    # TODO(synk): the linear_layer='sine' (SIREN) variant of Mlp is not
    # implemented; only the default linear + erf-GELU path is covered.
    print("KERNEL_OK")
</pallas_src>

<mosaic_0001>
module attributes {stable_mosaic.version = 11 : i64} {
  func.func @_mlp_kernel(%arg0: i32, %arg1: i32, %arg2: i32, %arg3: memref<8x32xf32, #tpu.memory_space<vmem>>, %arg4: memref<32x64xf32, #tpu.memory_space<vmem>>, %arg5: memref<1x64xf32, #tpu.memory_space<vmem>>, %arg6: memref<64x128xf32, #tpu.memory_space<vmem>>, %arg7: memref<1x128xf32, #tpu.memory_space<vmem>>, %arg8: memref<8x128xf32, #tpu.memory_space<vmem>>) attributes {dimension_semantics = [#tpu.dimension_semantics<parallel>, #tpu.dimension_semantics<parallel>, #tpu.dimension_semantics<arbitrary>], iteration_bounds = array<i64: 2, 1, 1>, scalar_prefetch = 0 : i64, scratch_operands = 0 : i64, tpu.core_type = #tpu.core_type<tc>, window_params = [{transform_indices = @transform_0, window_bounds = array<i64: 8, 32>}, {transform_indices = @transform_1, window_bounds = array<i64: 32, 64>}, {transform_indices = @transform_2, window_bounds = array<i64: 1, 64>}, {transform_indices = @transform_3, window_bounds = array<i64: 64, 128>}, {transform_indices = @transform_4, window_bounds = array<i64: 1, 128>}, {transform_indices = @transform_5, window_bounds = array<i64: 8, 128>}]} {
    %c0_i32 = arith.constant 0 : i32
    %0 = arith.cmpi eq, %arg2, %c0_i32 : i32
    %1 = arith.extui %0 : i1 to i32
    %c0_i32_0 = arith.constant 0 : i32
    %2 = arith.cmpi ne, %1, %c0_i32_0 : i32
    scf.if %2 {
      %cst_18 = arith.constant 0.000000e+00 : f32
      %25 = vector.broadcast %cst_18 : f32 to vector<8x128xf32>
      %c0_19 = arith.constant 0 : index
      %c0_20 = arith.constant 0 : index
      %26 = vector.load %arg8[%c0_19, %c0_20] : memref<8x128xf32, #tpu.memory_space<vmem>>, vector<8x128xf32>
      tpu.vector_store %arg8[%c0_19, %c0_20], %25 {strides = array<i32>} : memref<8x128xf32, #tpu.memory_space<vmem>>, vector<8x128xf32>,
    } else {
    }
    %c0 = arith.constant 0 : index
    %c0_1 = arith.constant 0 : index
    %3 = vector.load %arg3[%c0, %c0_1] : memref<8x32xf32, #tpu.memory_space<vmem>>, vector<8x32xf32>
    %c0_2 = arith.constant 0 : index
    %c0_3 = arith.constant 0 : index
    %4 = vector.load %arg4[%c0_2, %c0_3] : memref<32x64xf32, #tpu.memory_space<vmem>>, vector<32x64xf32>
    %cst = arith.constant dense<0.000000e+00> : vector<8x64xf32>
    %5 = tpu.matmul %3, %4, %cst {dimension_numbers = #tpu.dot_dimension_numbers<[1], [0], [0], [1], [0, 0, 1, 1], [], []>} : vector<8x32xf32>, vector<32x64xf32>, vector<8x64xf32> -> vector<8x64xf32>
    %c0_4 = arith.constant 0 : index
    %c0_5 = arith.constant 0 : index
    %6 = vector.load %arg5[%c0_4, %c0_5] : memref<1x64xf32, #tpu.memory_space<vmem>>, vector<1x64xf32>
    %7 = vector.broadcast %6 : vector<1x64xf32> to vector<8x64xf32>
    %8 = arith.addf %5, %7 : vector<8x64xf32>
    %cst_6 = arith.constant 5.000000e-01 : f32
    %9 = vector.broadcast %cst_6 : f32 to vector<8x64xf32>
    %10 = arith.mulf %9, %8 : vector<8x64xf32>
    %cst_7 = arith.constant 0.707106769 : f32
    %11 = vector.broadcast %cst_7 : f32 to vector<8x64xf32>
    %12 = arith.mulf %8, %11 : vector<8x64xf32>
    %13 = math.erf %12 : vector<8x64xf32>
    %cst_8 = arith.constant 1.000000e+00 : f32
    %14 = vector.broadcast %cst_8 : f32 to vector<8x64xf32>
    %15 = arith.addf %14, %13 : vector<8x64xf32>
    %16 = arith.mulf %10, %15 : vector<8x64xf32>
    %c0_9 = arith.constant 0 : index
    %c0_10 = arith.constant 0 : index
    %17 = vector.load %arg8[%c0_9, %c0_10] : memref<8x128xf32, #tpu.memory_space<vmem>>, vector<8x128xf32>
    %c0_11 = arith.constant 0 : index
    %c0_12 = arith.constant 0 : index
    %18 = vector.load %arg6[%c0_11, %c0_12] : memref<64x128xf32, #tpu.memory_space<vmem>>, vector<64x128xf32>
    %cst_13 = arith.constant dense<0.000000e+00> : vector<8x128xf32>
    %19 = tpu.matmul %16, %18, %cst_13 {dimension_numbers = #tpu.dot_dimension_numbers<[1], [0], [0], [1], [0, 0, 1, 1], [], []>} : vector<8x64xf32>, vector<64x128xf32>, vector<8x128xf32> -> vector<8x128xf32>
    %20 = arith.addf %17, %19 : vector<8x128xf32>
    %c0_14 = arith.constant 0 : index
    %c0_15 = arith.constant 0 : index
    %21 = vector.load %arg8[%c0_14, %c0_15] : memref<8x128xf32, #tpu.memory_space<vmem>>, vector<8x128xf32>
    tpu.vector_store %arg8[%c0_14, %c0_15], %20 {strides = array<i32>} : memref<8x128xf32, #tpu.memory_space<vmem>>, vector<8x128xf32>,
    %c0_i32_16 = arith.constant 0 : i32
    %22 = arith.cmpi eq, %arg2, %c0_i32_16 : i32
    %23 = arith.extui %22 : i1 to i32
    %c0_i32_17 = arith.constant 0 : i32
    %24 = arith.cmpi ne, %23, %c0_i32_17 : i32
    scf.if %24 {
      %c0_18 = arith.constant 0 : index
      %c0_19 = arith.constant 0 : index
      %25 = vector.load %arg8[%c0_18, %c0_19] : memref<8x128xf32, #tpu.memory_space<vmem>>, vector<8x128xf32>
      %c0_20 = arith.constant 0 : index
      %c0_21 = arith.constant 0 : index
      %26 = vector.load %arg7[%c0_20, %c0_21] : memref<1x128xf32, #tpu.memory_space<vmem>>, vector<1x128xf32>
      %27 = vector.broadcast %26 : vector<1x128xf32> to vector<8x128xf32>
      %28 = arith.addf %25, %27 : vector<8x128xf32>
      %c0_22 = arith.constant 0 : index
      %c0_23 = arith.constant 0 : index
      %29 = vector.load %arg8[%c0_22, %c0_23] : memref<8x128xf32, #tpu.memory_space<vmem>>, vector<8x128xf32>
      tpu.vector_store %arg8[%c0_22, %c0_23], %28 {strides = array<i32>} : memref<8x128xf32, #tpu.memory_space<vmem>>, vector<8x128xf32>,
    } else {
    }
    return
  }
  func.func @transform_0(%arg0: i32, %arg1: i32, %arg2: i32) -> (i32, i32) {
    %c0_i32 = arith.constant 0 : i32
    %c0_i32_0 = arith.constant 0 : i32
    return %arg0, %c0_i32 : i32, i32
  }
  func.func @transform_1(%arg0: i32, %arg1: i32, %arg2: i32) -> (i32, i32) {
    %c0_i32 = arith.constant 0 : i32
    %c0_i32_0 = arith.constant 0 : i32
    return %c0_i32, %arg2 : i32, i32
  }
  func.func @transform_2(%arg0: i32, %arg1: i32, %arg2: i32) -> (i32, i32) {
    %c0_i32 = arith.constant 0 : i32
    %c0_i32_0 = arith.constant 0 : i32
    return %c0_i32, %arg2 : i32, i32
  }
  func.func @transform_3(%arg0: i32, %arg1: i32, %arg2: i32) -> (i32, i32) {
    %c0_i32 = arith.constant 0 : i32
    return %arg2, %arg1 : i32, i32
  }
  func.func @transform_4(%arg0: i32, %arg1: i32, %arg2: i32) -> (i32, i32) {
    %c0_i32 = arith.constant 0 : i32
    %c0_i32_0 = arith.constant 0 : i32
    return %c0_i32, %arg1 : i32, i32
  }
  func.func @transform_5(%arg0: i32, %arg1: i32, %arg2: i32) -> (i32, i32) {
    %c0_i32 = arith.constant 0 : i32
    return %arg0, %arg1 : i32, i32
  }
}

</mosaic_0001>

<bundles_post_ra>
// kernel: tpu_custom_call.1
= control target key start
LH: loop header
LB: loop body
LE: loop exit
PB: predicated region body
PF: predicated region fallthrough
CT: control target
= control target key end

     0   :  { %10 = vsyncpa [#allocation3], 0  ;;  %s1325_s0 = inlined_call_operand.hbm [shape: f32[16,32], index: 0, kind: input, shape index: {}]   ;;  %s1326_s1 = inlined_call_operand.hbm [shape: f32[32,64], index: 1, kind: input, shape index: {}]   ;;  %s1327_s2 = inlined_call_operand.vmem [shape: f32[1,64], index: 2, kind: input, shape index: {}]   ;;  %s1328_s3 = inlined_call_operand.hbm [shape: f32[64,128], index: 3, kind: input, shape index: {}]   ;;  %s1329_s4 = inlined_call_operand.vmem [shape: f32[1,128], index: 4, kind: input, shape index: {}]   ;;  %s1330_s5 = inlined_call_operand.hbm [shape: f32[16,128], index: 5, kind: output, shape index: {}]  }
   0x1   :  { %12 = vsyncpa [#allocation3 + $0x1], 0 }
   0x2   :  { %13 = vsyncpa [#allocation6], 0 }
   0x3   :  { %14 = vsyncpa [#allocation4], 0 }
   0x4   :  { %16 = vsyncpa [#allocation4 + $0x1], 0  ;;  %s1065_s18 = smov 0   ;;  %s1067_s19 = smov 0  }
   0x5   :  { %s1069_s20 = smov 0   ;;  %s1071_s21 = smov 0  }
   0x6   :  { %s1073_s22 = smov 0   ;;  %s1075_s23 = smov 0  }
   0x7 LB: > { %s677_s24 = sadd.s32 4294967295, %s1024_s23   ;;  %s678_s25 = sadd.s32 4294967294, %s1024_s23   ;;  %s1024_s23 = sphi %s1075_s23, %s22_s23   ;;  %s1020_s22 = sphi %s1073_s22, %s1352_s22   ;;  %s1016_s21 = sphi %s1071_s21, %s1351_s21   ;;  %s1012_s20 = sphi %s1069_s20, %s1350_s20   ;;  %s1008_s19 = sphi %s1067_s19, %s1349_s19   ;;  %s1004_s18 = sphi %s1065_s18, %s1348_s18  }
   0x8   : > { %p61_p0 = scmp.ne.s32.totalorder %s1008_s19, %s1004_s18  ;;  %p1099_p1 = scmp.eq.s32.totalorder %s677_s24, 0 }
   0x9   : > { %p1103_p2 = scmp.eq.s32.totalorder %s677_s24, 1  ;;  %p199_p3 = scmp.eq.s32.totalorder %s678_s25, 1 }
   0xa   : > { %s1335_s26 = scalar_select %p1099_p1, 1, 0 }
   0xb   : > { %p1109_p4 = por %p1099_p1, %p61_p0  ;;  %p679_p5 = scmp.ge.s32.totalorder %s1024_s23, 1 }
   0xc   : > { %p1114_p6 = por %p199_p3, %p61_p0  ;;  %p206_p7 = scmp.lt.s32.totalorder %s1024_s23, 3 }
   0xd   : > { %s1337_s28 = scalar_select %p1109_p4, 1, 0 }
   0xe   : > { %s1338_s29 = scalar_select %p1114_p6, 1, 0 }
   0xf   : > { %p1119_p8 = pnand %p679_p5, %p206_p7  ;;  %s1026_s6 = smov [#allocation5]  }
  0x10   : > { %s220_s7 = sshll.u32 %s1026_s6, 4  ;;  %s1027_s9 = smov [#allocation7]   ;;  %s1123_s7 = int_to_ptr.vmem [resolvable:$true] %s220_s7 }
  0x11   : > { %p774_p9 = pneg %p1119_p8  ;;  %s243_s10 = sshll.u32 %s1027_s9, 4  ;;  %s1134_s10 = int_to_ptr.vmem [resolvable:$true] %s243_s10 }
  0x12   : > { %s852_s13 = scalar_lea.hbm %s1326_s1, 512 }
  0x13   : > { %p1130_p11 = pnand %p774_p9, %p1099_p1  ;;  %p853_p12 = scmp.ne.s32.totalorder %s1326_s1, %s852_s13 }
  0x14   : > { %p859_p5 = scmp.lt.u32.totalorder %s852_s13, %s1326_s1 }
  0x15   : > { %p854_p13 = pneg %p1130_p11 }
  0x17   : > { %p855_p0 = pnand %p854_p13, %p853_p12 }
  0x19   : > { %p856_p3 = pneg %p855_p0 }
  0x1b   : > { %p861_p7 = pnand %p859_p5, %p856_p3 }
  0x1d   : > { %864 = shalt.err (!%p861_p7)
}
  0x1e   : > { %s865_s24 = scalar_lea.vmem %s1123_s7, 512  ;;  %p873_p1 = scmp.lt.s32.totalorder %s1123_s7, %s1123_s7 }
  0x1f   : > { %p866_p9 = scmp.ne.s32.totalorder %s1123_s7, %s865_s24  ;;  %p874_p12 = scmp.lt.s32.totalorder %s865_s24, %s865_s24 }
  0x21   : > { %p868_p10 = pnand %p866_p9, %p854_p13  ;;  %p875_p0 = por %p874_p12, %p873_p1 }
  0x23   : > { %p869_p6 = pneg %p868_p10 }
  0x25   : > { %p876_p4 = pnand %p875_p0, %p869_p6 }
  0x27   : > { %879 = shalt.err (!%p876_p4)
}
  0x28   : > { %s1028_s25 = smov 128   ;;  %s1029_s6 = smov 8  }
  0x29   : > { %777 = dma.hbm_to_vmem [thread:$0]  (!%p1130_p11), %s1326_s1, 512, %s1123_s7, [#allocation6], %s1028_s25, %s1028_s25, %s1029_s6  }
  0x2a   : > { %s880_s14 = scalar_lea.hbm %s1328_s3, 1024 }
  0x2b   : > { %p881_p1 = scmp.ne.s32.totalorder %s1328_s3, %s880_s14  ;;  %p887_p10 = scmp.lt.u32.totalorder %s880_s14, %s1328_s3 }
  0x2d   : > { %p883_p4 = pnand %p881_p1, %p854_p13 }
  0x2f   : > { %p884_p6 = pneg %p883_p4 }
  0x31   : > { %p889_p3 = pnand %p887_p10, %p884_p6 }
  0x33   : > { %892 = shalt.err (!%p889_p3)
}
  0x34   : > { %s893_s7 = scalar_lea.vmem %s1134_s10, 1024  ;;  %p901_p12 = scmp.lt.s32.totalorder %s1134_s10, %s1134_s10 }
  0x35   : > { %p894_p5 = scmp.ne.s32.totalorder %s1134_s10, %s893_s7  ;;  %p902_p0 = scmp.lt.s32.totalorder %s893_s7, %s893_s7 }
  0x37   : > { %p896_p7 = pnand %p894_p5, %p854_p13  ;;  %p903_p1 = por %p902_p0, %p901_p12 }
  0x39   : > { %p897_p9 = pneg %p896_p7 }
  0x3b   : > { %p904_p4 = pnand %p903_p1, %p897_p9 }
  0x3d   : > { %907 = shalt.err (!%p904_p4)
}
  0x3e   : > { %780 = dma.hbm_to_vmem [thread:$0]  (!%p1130_p11), %s1328_s3, 1024, %s1134_s10, [#allocation6], %s1028_s25, %s1028_s25, %s1029_s6  }
  0x3f   : > { %s41_s12 = sadd.s32 1, %s1020_s22  ;;  %s48_s13 = sadd.s32 1, %s1012_s20 }
  0x40   : > { %p43_p13 = scmp.ge.s32.totalorder %s41_s12, 2  ;;  %p55_p6 = scmp.ne.s32.totalorder %s1012_s20, %s1008_s19 }
  0x41   : > { %p56_p10 = scmp.eq.s32.totalorder %s1024_s23, 0  ;;  %p791_p3 = scmp.lt.s32.totalorder %s1024_s23, 2 }
  0x42   : > { %s1354_s12 = smov (%p43_p13, %s41_s12), 0  ;;  %p1198_p7 = por %p1103_p2, %p55_p6 }
  0x43   : > { %p57_p5 = por %p56_p10, %p55_p6  ;;  %s45_s14 = ssub.s32 %s1020_s22, %s1354_s12 }
  0x44   : > { %s1341_s8 = scalar_select %p1198_p7, 1, 0 }
  0x45   : > { %s263_s15 = sand.u32 1, %s1012_s20   ;;  %p46_p9 = scmp.eq.s32.totalorder %s45_s14, 0 }
  0x46   : > { %s685_s10 = sshll.u32 %s263_s15, 3  ;;  %s686_s25 = sshll.u32 %s1020_s22, 7 }
  0x47   : > { %s1207_s6 = scalar_select %p46_p9, %s1012_s20, %s48_s13  }
  0x48   : > { %s1212_s24 = scalar_lea.hbm %s1325_s0, %s686_s25  ;;  %s267_s27 = scalar_lea.vmem [#allocation2], %s685_s10 }
  0x49   : > { %s274_s7 = sshll.u32 %s267_s27, 4  ;;  %p1216_p2 = pnand %p791_p3, %p57_p5  ;;  %s1220_s7 = int_to_ptr.vmem [resolvable:$true] %s274_s7 }
  0x4a   : > { %s264_s11 = scalar_lea.sflag [#allocation3], %s263_s15  ;;  %s908_s13 = scalar_lea.hbm %s1212_s24, 128 }
  0x4b   : > { %p909_p11 = scmp.ne.s32.totalorder %s1212_s24, %s908_s13  ;;  %p910_p12 = pneg %p1216_p2 }
  0x4c   : > { %s913_s25 = scalar_lea.hbm %s1325_s0, 256  ;;  %p914_p4 = scmp.lt.u32.totalorder %s1212_s24, %s1325_s0 }
  0x4d   : > { %p911_p0 = pnand %p910_p12, %p909_p11  ;;  %p915_p13 = scmp.lt.u32.totalorder %s913_s25, %s908_s13 }
  0x4e   : > { %p917_p10 = scmp.lt.u32.totalorder %s908_s13, %s1212_s24 }
  0x4f   : > { %p912_p1 = pneg %p911_p0  ;;  %p916_p6 = por %p915_p13, %p914_p4 }
  0x51   : > { %p918_p3 = por %p917_p10, %p916_p6 }
  0x53   : > { %p919_p5 = pnand %p918_p3, %p912_p1 }
  0x55   : > { %922 = shalt.err (!%p919_p5)
}
  0x56   : > { %s923_s15 = scalar_lea.vmem %s1220_s7, 128  ;;  %s1030_s27 = smov [#allocation2]  }
  0x57   : > { %p924_p9 = scmp.ne.s32.totalorder %s1220_s7, %s923_s15  ;;  %s928_s14 = sshll.u32 %s1030_s27, 4  ;;  %s929_s14 = int_to_ptr.vmem [resolvable:$false] %s928_s14 }
  0x58   : > { %s930_s10 = scalar_lea.vmem %s929_s14, 256  ;;  %p931_p7 = scmp.lt.s32.totalorder %s1220_s7, %s929_s14 }
  0x59   : > { %p926_p11 = pnand %p924_p9, %p910_p12  ;;  %p932_p4 = scmp.lt.s32.totalorder %s930_s10, %s923_s15 }
  0x5b   : > { %p927_p0 = pneg %p926_p11  ;;  %p933_p13 = por %p932_p4, %p931_p7 }
  0x5d   : > { %p934_p6 = pnand %p933_p13, %p927_p0 }
  0x5f   : > { %937 = shalt.err (!%p934_p6)
}
  0x60   : > { %784 = dma.hbm_to_vmem [thread:$0]  (!%p1216_p2), %s1212_s24, 128, %s1220_s7, %s264_s11  }
  0x61   : > { %283 = sbr.rel (%p1119_p8) target bundleno = 578 (0x242), region = 40  ;;  %s1250_s13 = sand.u32 (!%p1119_p8), 1, %s1008_s19  }
  0x62   : > { %s688_s25 = sshll.u32 (!%p1119_p8), %s1250_s13, 3  ;;  %s286_s16 = scalar_lea.sflag (!%p1119_p8), [#allocation3], %s1250_s13 }
  0x63   : > { %s289_s17 = scalar_lea.vmem (!%p1119_p8), [#allocation2], %s688_s25  ;;  %p1343_p7 = scmp.ne.s32.totalorder (!%p1119_p8), %s1337_s28, 0 }
  0x68   : > { %991 = dma.done.wait (%p1343_p7), %s286_s16, 128  }
  0x69   : > { %993 = vsyncadd (%p1343_p7), %s286_s16, 4294967168  ;;  %p1344_p2 = scmp.ne.s32.totalorder %s1335_s26, 0 }
  0x6b   : > { %995 = dma.done.wait (%p1344_p2), [#allocation6], 1536  }
  0x6c   : > { %997 = vsyncadd (%p1344_p2), [#allocation6], 4294965760  ;;  %v1031_v0 = vmov 0.0|0.0   ;;  %vm1032_vm0 = vmmov 0   ;;  %v1033_v1 = vmov 0.0   ;;  %v343_v2 = vld [vmem:[#allocation5] sm:$0xff] }
  0x6d   : > { %744 = vmatprep.subr.bf16.mxu0 %v1031_v0  ;;  %722 = vmatprep.mubr.msk.f32.mxu0 %vm1032_vm0, %v1033_v1  ;;  %v344_v3 = vld [vmem:[#allocation5 + $0x8] sm:$0xff]  ;;  %v345_v4 = vld [vmem:[#allocation5 + $0x10] sm:$0xff]  ;;  %v346_v6 = vld [vmem:[#allocation5 + $0x18] sm:$0xff]  ;;  %vm354_vm1 = vcmask 261120   ;;  %vm442_vm2 = vcmask 523264   ;;  %s697_s7 = sshll.u32 %s1016_s21, 7 }
  0x6e   : > { %750 = vmatprep.subr.bf16.mxu1 %v1031_v0  ;;  %741 = vmatprep.mubr.msk.f32.mxu1 %vm1032_vm0, %v1033_v1  ;;  %v745_v5 = vpack.c.bf16 %v344_v3, %v343_v2  ;;  %v748_v7 = vpack.c.bf16 %v346_v6, %v345_v4  ;;  %v342_v8 = vld [vmem:[%s289_s17] sm:$0xff]  ;;  %v434_v9 = vld [vmem:[#allocation7] sm:$0xff]  ;;  %v435_v10 = vld [vmem:[#allocation7 + $0x8] sm:$0xff]  ;;  %s329_s9 = scalar_lea.vmem [#allocation8], %s688_s25  ;;  %s1276_s14 = scalar_lea.hbm %s1330_s5, %s697_s7 }
  0x6f   : > { %v751_v11 = vpack.c.bf16 %v435_v10, %v434_v9  ;;  %v436_v12 = vld [vmem:[#allocation7 + $0x10] sm:$0xff]  ;;  %v437_v13 = vld [vmem:[#allocation7 + $0x18] sm:$0xff]  ;;  %v438_v15 = vld [vmem:[#allocation7 + $0x20] sm:$0xff]  ;;  %s546_s11 = sshll.u32 %s329_s9, 4  ;;  %s532_s10 = scalar_lea.sflag [#allocation4], %s1250_s13  ;;  %s1278_s11 = int_to_ptr.vmem [resolvable:$true] %s546_s11 }
  0x70   : > { %746 = vmatpush3.bf16.msra.mxu0 %v745_v5  ;;  %v754_v14 = vpack.c.bf16 %v437_v13, %v436_v12  ;;  %v439_v16 = vld [vmem:[#allocation7 + $0x28] sm:$0xff]  ;;  %v440_v18 = vld [vmem:[#allocation7 + $0x30] sm:$0xff]  ;;  %v441_v19 = vld [vmem:[#allocation7 + $0x38] sm:$0xff]  ;;  %s938_s16 = scalar_lea.vmem %s1278_s11, 128  ;;  %p1345_p12 = scmp.ne.s32.totalorder %s1341_s8, 0 }
  0x71   : > { %747 = vmatprep.subr.bf16.mxu0 %v1031_v0  ;;  %752 = vmatpush3.bf16.msra.mxu1 %v751_v11  ;;  %v757_v17 = vpack.c.bf16 %v439_v16, %v438_v15  ;;  %v760_v20 = vpack.c.bf16 %v441_v19, %v440_v18  ;;  %v692_v21 = vld [vmem:[%s1327_s2] ss:$0 sm:$0xff]  ;;  %p939_p8 = scmp.ne.s32.totalorder %s1278_s11, %s938_s16  ;;  %s1034_s21 = smov [#allocation8]  }
  0x72   : > { %753 = vmatprep.subr.bf16.mxu1 %v1031_v0  ;;  %v695_v31 = vld [vmem:[%s1329_s4] ss:$0 sm:$0xff]  ;;  %s942_s25 = sshll.u32 %s1034_s21, 4  ;;  %s943_s25 = int_to_ptr.vmem [resolvable:$false] %s942_s25 }
  0x73   : > { %p940_p1 = pnand %p939_p8, %p1345_p12  ;;  %s944_s17 = scalar_lea.vmem %s943_s25, 256 }
  0x74   : > { %749 = vmatpush3.bf16.msra.mxu0 %v748_v7  ;;  %p945_p3 = scmp.lt.s32.totalorder %s1278_s11, %s943_s25  ;;  %p946_p5 = scmp.lt.s32.totalorder %s944_s17, %s938_s16 }
  0x75   : > { %755 = vmatpush3.bf16.msra.mxu1 %v754_v14  ;;  %p941_p10 = pneg %p940_p1 }
  0x76   : > { %756 = vmatprep.subr.bf16.mxu1 %v1031_v0  ;;  %p947_p9 = por %p946_p5, %p945_p3 }
  0x77   : > { %723 = vmatmul.mubr.msk.f32.vlgmr.msra.gmra.mrb[0].mxu0 %vm354_vm1, %v342_v8 }
  0x78   : > { %p948_p11 = pnand %p947_p9, %p941_p10 }
  0x79   : > { %758 = vmatpush3.bf16.msra.mxu1 %v757_v17 }
  0x7a   : > { %759 = vmatprep.subr.bf16.mxu1 %v1031_v0 }
  0x7d   : > { %761 = vmatpush3.bf16.msra.mxu1 %v760_v20 }
 0x14a   : > { %v424_v22 = vpop.f32.mrb[0].mxu0 }
 0x14b   : > { %v425_v23 = vadd.f32 %v692_v21, %v424_v22  ;;  %v724_v24 = vpop.f32.mrb[1].mxu0 }
 0x14d   : > { %v429_v25 = vmul.f32 0.70710677, %v425_v23  ;;  %v428_v27 = vmul.f32 0.5, %v425_v23 }
 0x14f   : > { %850 = verf.f32 %v429_v25 }
 0x159   : > { %v851_v26 = vpop.eup %850 }
 0x15a   : > { %v431_v28 = vadd.f32 1.0, %v851_v26 }
 0x15c   : > { %v432_v29 = vmul.f32 %v431_v28, %v428_v27 }
 0x15e   : > { %742 = vmatmul.mubr.msk.f32.vlgmr.msra.gmra.mrb[0].mxu1 %vm442_vm2, %v432_v29 }
 0x231   : > { %v512_v30 = vpop.f32.mrb[0].mxu1 }
 0x232   : > { %v743_v32 = vpop.f32.mrb[1].mxu1  ;;  %v529_v33 = vadd.f32 %v695_v31, %v512_v30 }
 0x234   : > { %530 = vst [vmem:[%s329_s9] sm:$0xff] %v529_v33 }
 0x235   : > { %951 = shalt.err (!%p948_p11)
}
 0x236   : > { %s952_s13 = scalar_lea.hbm %s1276_s14, 128  ;;  %s956_s30 = scalar_lea.hbm %s1330_s5, 256 }
 0x237   : > { %p953_p0 = scmp.ne.s32.totalorder %s1276_s14, %s952_s13  ;;  %p957_p6 = scmp.lt.u32.totalorder %s1276_s14, %s1330_s5 }
 0x238   : > { %p958_p7 = scmp.lt.u32.totalorder %s956_s30, %s952_s13  ;;  %p960_p8 = scmp.lt.u32.totalorder %s952_s13, %s1276_s14 }
 0x239   : > { %p954_p4 = pnand %p953_p0, %p1345_p12 }
 0x23a   : > { %p959_p2 = por %p958_p7, %p957_p6 }
 0x23b   : > { %p955_p13 = pneg %p954_p4 }
 0x23c   : > { %p961_p1 = por %p960_p8, %p959_p2 }
 0x23e   : > { %p962_p10 = pnand %p961_p1, %p955_p13 }
 0x240   : > { %965 = shalt.err (!%p962_p10)
}
 0x241   : > { %772 = dma.vmem_to_hbm [thread:$0]  (%p1345_p12), %s1278_s11, 128, %s1276_s14, %s532_s10  }
 0x242 PF: > { %s558_s9 = sand.u32 1, %s1004_s18   ;;  %p1346_p3 = scmp.ne.s32.totalorder %s1338_s29, 0 }
 0x243   : > { %p1347_p5 = scmp.ge.s32.totalorder %s1024_s23, 2  ;;  %s559_s15 = scalar_lea.sflag [#allocation4], %s558_s9 }
 0x245   : > { %p786_p9 = pnand %p1347_p5, %p1346_p3 }
 0x247   : > { %999 = dma.done.wait (!%p786_p9), %s559_s15, 128  }
 0x248   : > { %1001 = vsyncadd (!%p786_p9), %s559_s15, 4294967168  ;;  %s22_s23 = sadd.s32 1, %s1024_s23   ;;  %s1348_s18 = smov %s1008_s19 }
 0x249   : > { %p19_p11 = scmp.ge.s32.totalorder %s22_s23, 4   ;;  %s1349_s19 = smov %s1012_s20 }
 0x24a   : > { %s1350_s20 = smov %s1207_s6  ;;  %s1351_s21 = smov %s1020_s22 }
 0x24b   : > { %s1352_s22 = smov %s1354_s12  ;;  %21 = sbr.rel (!%p19_p11) target bundleno = 7 (0x7), region = 109 }
 0x252   :  { %564 = vsyncpa [#allocation3], 1 }
 0x253   :  { %566 = vsyncpa [#allocation3 + $0x1], 1 }
 0x254   :  { %567 = vsyncpa [#allocation6], 1 }
 0x255   :  { %568 = vsyncpa [#allocation4], 1 }
 0x256   :  { %570 = vsyncpa [#allocation4 + $0x1], 1 }

</bundles_post_ra>
